<compile_context>
chip_gen: v6e
topology: v6e:2x2x1
jax: 0.10.0
libtpu: 0.0.40
codegen_flags: <defaults>
</compile_context>

<pallas_src>
import functools
import math

import jax
import jax.numpy as jnp
from jax.experimental import pallas as pl
from jax.experimental.pallas import tpu as pltpu

_ACT_GAMMA = 1.7881293296813965   # timm _nonlin_gamma['silu'] (eca_nfnet_l* act)
_ALPHA = 0.2                      # NF block alpha
_BETA = 1.0                       # first block after the stem: expected_std = 1
_ATTN_GAIN = 2.0                  # timm NF block attention gain
_LANE = 128                       # lane-dense channel width / classifier slab


def _act(x):
    return jax.nn.silu(x)


def _row_tile(m, cap=128):
    """Largest multiple-of-8 divisor of m that is <= cap (falls back to m)."""
    t = min(m, cap)
    while t > 0:
        if m % t == 0 and t % 8 == 0:
            return t
        t -= 1
    return m


# ----------------------------- Pallas kernels ------------------------------

def _stem_c1_kernel(p_ref, ws_ref, bs_ref, w1_ref, b1_ref, short_ref, h_ref,
                    *, pre_scale, act_scale):
    """Fused stem WS-conv (im2col matmul, no trailing act) + NF pre-activation
    + c1 1x1 WS-conv + gamma-act.  Emits the pre-activation shortcut and the c1
    activation, both bf16.  bf16 MXU operands, f32 accumulation/epilogue."""
    s = jnp.dot(p_ref[0], ws_ref[...], preferred_element_type=jnp.float32)
    s = s + bs_ref[...]
    short_ref[0] = s.astype(short_ref.dtype)
    a = (_act(s) * pre_scale).astype(jnp.bfloat16)
    h = jnp.dot(a, w1_ref[...], preferred_element_type=jnp.float32) + b1_ref[...]
    h_ref[0] = (_act(h) * act_scale).astype(h_ref.dtype)


def _conv3x3_kernel(x_ref, w_ref, b_ref, o_ref, *, H, W, act_scale):
    """3x3 stride-1 'SAME' conv on a flattened (HW, C) tile: 9 accumulated
    matmuls over pltpu.roll-shifted views with iota boundary masks.  The zero
    halo is absorbed by the masks, so there is no wrapper-side pad and no
    per-tap slice/reshape VMEM copy."""
    hw = x_ref.shape[1]
    cout = o_ref.shape[-1]
    x = x_ref[0].astype(jnp.float32)                                  # (HW, Cm)
    r = jax.lax.broadcasted_iota(jnp.int32, (hw, 1), 0)
    i = r // W
    j = r - i * W
    acc = jnp.zeros((hw, cout), jnp.float32)
    for di in range(3):
        for dj in range(3):
            oi, oj = di - 1, dj - 1
            s = oi * W + oj
            shifted = pltpu.roll(x, shift=(-s) % hw, axis=0) if s else x
            valid = ((i + oi >= 0) & (i + oi < H) &
                     (j + oj >= 0) & (j + oj < W))
            tap = jnp.where(valid, shifted, 0.0).astype(jnp.bfloat16)
            acc = acc + jnp.dot(tap, w_ref[di * 3 + dj],
                                preferred_element_type=jnp.float32)
    acc = acc + b_ref[...]
    o_ref[0] = (_act(acc) * act_scale).astype(o_ref.dtype)
    # TODO(synk): at real eca_nfnet_l2 resolution add an H-row-tile grid axis
    # (halo rows) and a K "arbitrary" axis + VMEM accumulator for wide channels.


def _eca_c3_head_kernel(h_ref, short_ref, eca_ref, w3_ref, b3_ref,
                        fcw_ref, fcb_ref, o_ref,
                        *, attn_gain, res_scale, act_scale):
    """Fused tail: ECA (global pool -> k=3 channel conv via lane rolls ->
    sigmoid gate) -> gated c3 1x1 conv -> alpha*skip_gain residual ->
    gamma-act -> global average pool -> linear head.  Only the logits leave
    VMEM; the (HW, C) residual is never written to HBM."""
    h = h_ref[0]                                                      # (HW, Cm) bf16
    # ECA gate: 3-tap 1-D channel conv on the pooled vector via lane rolls.
    pooled = jnp.mean(h.astype(jnp.float32), axis=0, keepdims=True)   # (1, Cm)
    c = pooled.shape[-1]
    lane = jax.lax.broadcasted_iota(jnp.int32, (1, c), 1)
    left = jnp.where(lane > 0, pltpu.roll(pooled, shift=1, axis=1), 0.0)
    right = jnp.where(lane < c - 1, pltpu.roll(pooled, shift=c - 1, axis=1), 0.0)
    eca = eca_ref[...]                                                # (3, Cm) f32
    gate = jax.nn.sigmoid(eca[0:1] * left + eca[1:2] * pooled + eca[2:3] * right)
    # Gated c3 1x1 conv (bf16 gating: half the vreg footprint of the operand).
    a = h * (gate * attn_gain).astype(jnp.bfloat16)                   # (HW, Cm) bf16
    acc = jnp.dot(a, w3_ref[...], preferred_element_type=jnp.float32)
    acc = acc + b3_ref[...]
    res = short_ref[0].astype(jnp.float32) + res_scale * acc          # (HW, C) f32
    # Head: gamma-act -> global average pool -> classifier (lane-dense slab).
    feat = jnp.mean(_act(res) * act_scale, axis=0, keepdims=True)     # (1, C)
    logits = jnp.dot(feat.astype(jnp.bfloat16), fcw_ref[...],
                     preferred_element_type=jnp.float32) + fcb_ref[...]
    o_ref[0] = logits.astype(o_ref.dtype)
    # TODO(synk): at real resolution split into a pooling pass + row-tiled
    # gated-matmul pass so the (HW, C) block need not be VMEM-resident at once.


# --------------------------- kernel wrappers --------------------------------

def pallas_stem_c1(patches, ws, bs, w1, b1, *, pre_scale, act_scale,
                   row_tile_cap=128):
    """patches: (N, HW, Kp) bf16 -> (shortcut (N,HW,C) bf16, h (N,HW,Cm) bf16)."""
    N, M, Kp = patches.shape
    C = ws.shape[1]
    Cm = w1.shape[1]
    tm = _row_tile(M, row_tile_cap)
    kern = functools.partial(_stem_c1_kernel, pre_scale=pre_scale,
                             act_scale=act_scale)
    return pl.pallas_call(
        kern,
        out_shape=(jax.ShapeDtypeStruct((N, M, C), jnp.bfloat16),
                   jax.ShapeDtypeStruct((N, M, Cm), jnp.bfloat16)),
        grid=(N, M // tm),
        in_specs=[
            pl.BlockSpec((1, tm, Kp), lambda n, i: (n, i, 0)),
            pl.BlockSpec((Kp, C), lambda n, i: (0, 0)),
            pl.BlockSpec((1, C), lambda n, i: (0, 0)),
            pl.BlockSpec((C, Cm), lambda n, i: (0, 0)),
            pl.BlockSpec((1, Cm), lambda n, i: (0, 0)),
        ],
        out_specs=(pl.BlockSpec((1, tm, C), lambda n, i: (n, i, 0)),
                   pl.BlockSpec((1, tm, Cm), lambda n, i: (n, i, 0))),
        compiler_params=pltpu.CompilerParams(
            dimension_semantics=("parallel", "parallel")),
    )(patches, ws, bs, w1, b1)


def pallas_conv3x3(h_flat, taps, bias, *, H, W, act_scale):
    """h_flat: (N, HW, Cm) bf16, taps: (9, Cm, Cout) bf16 -> (N, HW, Cout) bf16."""
    N, HW, Cm = h_flat.shape
    Cout = taps.shape[-1]
    kern = functools.partial(_conv3x3_kernel, H=H, W=W, act_scale=act_scale)
    return pl.pallas_call(
        kern,
        out_shape=jax.ShapeDtypeStruct((N, HW, Cout), jnp.bfloat16),
        grid=(N,),
        in_specs=[
            pl.BlockSpec((1, HW, Cm), lambda n: (n, 0, 0)),
            pl.BlockSpec((9, Cm, Cout), lambda n: (0, 0, 0)),
            pl.BlockSpec((1, Cout), lambda n: (0, 0)),
        ],
        out_specs=pl.BlockSpec((1, HW, Cout), lambda n: (n, 0, 0)),
        compiler_params=pltpu.CompilerParams(dimension_semantics=("parallel",)),
    )(h_flat, taps, bias)


def pallas_eca_c3_head(h, shortcut, eca_b, w3, b3, fc_w, fc_b, *,
                       attn_gain, res_scale, act_scale):
    """h/shortcut: (N, HW, C*) bf16 -> logits slab (N, 1, 128) f32."""
    N, HW, Cm = h.shape
    C = w3.shape[-1]
    Cp = fc_w.shape[-1]
    kern = functools.partial(_eca_c3_head_kernel, attn_gain=attn_gain,
                             res_scale=res_scale, act_scale=act_scale)
    return pl.pallas_call(
        kern,
        out_shape=jax.ShapeDtypeStruct((N, 1, Cp), jnp.float32),
        grid=(N,),
        in_specs=[
            pl.BlockSpec((1, HW, Cm), lambda n: (n, 0, 0)),
            pl.BlockSpec((1, HW, C), lambda n: (n, 0, 0)),
            pl.BlockSpec((3, Cm), lambda n: (0, 0)),
            pl.BlockSpec((Cm, C), lambda n: (0, 0)),
            pl.BlockSpec((1, C), lambda n: (0, 0)),
            pl.BlockSpec((C, Cp), lambda n: (0, 0)),
            pl.BlockSpec((1, Cp), lambda n: (0, 0)),
        ],
        out_specs=pl.BlockSpec((1, 1, Cp), lambda n: (n, 0, 0)),
        compiler_params=pltpu.CompilerParams(dimension_semantics=("parallel",)),
    )(h, shortcut, eca_b, w3, b3, fc_w, fc_b)


# ------------------------------- conv glue ----------------------------------

def _standardize_weight(w, gain, eps=1e-6):
    # Scaled weight standardization (ScaledStdConv2d): per-output-filter
    # normalization over (Cin, KH, KW) with 1/sqrt(fan_in) scaling and gain.
    fan_in = w.shape[1] * w.shape[2] * w.shape[3]
    mean = jnp.mean(w, axis=(1, 2, 3), keepdims=True)
    var = jnp.var(w, axis=(1, 2, 3), keepdims=True)
    scale = gain.reshape(-1, 1, 1, 1) / math.sqrt(fan_in)
    return scale * (w - mean) / jnp.sqrt(var + eps)


def _ws_matmul_weight(w, gain):
    """(Cout,Cin,kh,kw) -> (kh*kw*Cin, Cout) bf16 for im2col / 1x1 matmuls."""
    cout, cin, kh, kw = w.shape
    w_hat = _standardize_weight(w, gain)
    return (jnp.transpose(w_hat, (2, 3, 1, 0))
            .reshape(kh * kw * cin, cout).astype(jnp.bfloat16))


def _ws_tap_weight(w, gain):
    """(Cout,Cin,3,3) -> (9, Cin, Cout) bf16 tap stack for the in-kernel conv."""
    cout, cin, kh, kw = w.shape
    w_hat = _standardize_weight(w, gain)
    return (jnp.transpose(w_hat, (2, 3, 1, 0))
            .reshape(kh * kw, cin, cout).astype(jnp.bfloat16))


def _im2col(x_nhwc, kh, kw, stride, pad, k_pad_to=None, out_dtype=jnp.bfloat16):
    # Only used for the 3-channel stem (K = 27 -> zero-padded to 32, bf16).
    N, H, W, C = x_nhwc.shape
    xp = jnp.pad(x_nhwc, ((0, 0), (pad, pad), (pad, pad), (0, 0)))
    OH = (H + 2 * pad - kh) // stride + 1
    OW = (W + 2 * pad - kw) // stride + 1
    cols = []
    for i in range(kh):
        for j in range(kw):
            cols.append(xp[:, i:i + stride * OH:stride, j:j + stride * OW:stride, :])
    patches = jnp.concatenate(cols, axis=-1)
    if k_pad_to is not None and patches.shape[-1] < k_pad_to:
        patches = jnp.pad(
            patches, ((0, 0), (0, 0), (0, 0), (0, k_pad_to - patches.shape[-1])))
    return patches.astype(out_dtype).reshape(N, OH * OW, -1), (N, OH, OW)


# ------------------------------ model ----------------------------------------

def init_params(key, num_classes=18, c_in=3, c_stem=_LANE, c_mid=_LANE):
    ks = jax.random.split(key, 8)

    def conv_w(k, cout, cin, kh, kw):
        fan_in = cin * kh * kw
        return jax.random.normal(k, (cout, cin, kh, kw), jnp.float32) / math.sqrt(fan_in)

    return dict(
        stem_w=conv_w(ks[0], c_stem, c_in, 3, 3),
        stem_g=jnp.ones((c_stem,), jnp.float32),
        stem_b=jnp.zeros((c_stem,), jnp.float32),
        c1_w=conv_w(ks[1], c_mid, c_stem, 1, 1),
        c1_g=jnp.ones((c_mid,), jnp.float32),
        c1_b=jnp.zeros((c_mid,), jnp.float32),
        c2_w=conv_w(ks[2], c_mid, c_mid, 3, 3),
        c2_g=jnp.ones((c_mid,), jnp.float32),
        c2_b=jnp.zeros((c_mid,), jnp.float32),
        c3_w=conv_w(ks[3], c_stem, c_mid, 1, 1),
        c3_g=jnp.ones((c_stem,), jnp.float32),
        c3_b=jnp.zeros((c_stem,), jnp.float32),
        eca_w=jax.random.normal(ks[4], (3,), jnp.float32) * 0.1,
        skip_gain=1.0,  # python float; baked into the residual scale
        fc_w=jax.random.normal(ks[5], (c_stem, num_classes), jnp.float32) / math.sqrt(c_stem),
        fc_b=jnp.zeros((num_classes,), jnp.float32),
    )


def _prep_weights(params):
    num_classes = params['fc_w'].shape[1]
    c_stem = params['stem_w'].shape[0]
    c_mid = params['c1_w'].shape[0]
    stem_w = _ws_matmul_weight(params['stem_w'], params['stem_g'])   # (27, C) bf16
    k_pad = 32                                                        # unmasked sublanes
    stem_w = jnp.pad(stem_w, ((0, k_pad - stem_w.shape[0]), (0, 0)))
    fc_w = (jnp.zeros((c_stem, _LANE), jnp.float32)
            .at[:, :num_classes].set(params['fc_w']))
    fc_b = (jnp.zeros((1, _LANE), jnp.float32)
            .at[:, :num_classes].set(params['fc_b']))
    return dict(
        k_pad=k_pad,
        stem_w=stem_w,
        stem_b=params['stem_b'].reshape(1, -1),
        c1_w=_ws_matmul_weight(params['c1_w'], params['c1_g']),
        c1_b=params['c1_b'].reshape(1, -1),
        c2_taps=_ws_tap_weight(params['c2_w'], params['c2_g']),
        c2_b=params['c2_b'].reshape(1, -1),
        eca_b=jnp.broadcast_to(params['eca_w'].reshape(3, 1), (3, c_mid)).astype(jnp.float32),
        c3_w=_ws_matmul_weight(params['c3_w'], params['c3_g']),
        c3_b=params['c3_b'].reshape(1, -1),
        fc_w=fc_w.astype(jnp.bfloat16),
        fc_b=fc_b,
        res_scale=float(_ALPHA * params['skip_gain']),
        num_classes=num_classes,
    )


def nfnet_forward(params, x_nchw):
    w = _prep_weights(params)
    # NCHW (PyTorch) -> NHWC internal layout (channels on the 128-lane axis).
    x = jnp.transpose(x_nchw, (0, 2, 3, 1)).astype(jnp.float32)

    # (1) Stem (3x3 stride-2 WS conv, no trailing act) + NF pre-activation + c1.
    patches, (N, H, Wsp) = _im2col(x, 3, 3, stride=2, pad=1, k_pad_to=w['k_pad'])
    shortcut, h = pallas_stem_c1(patches, w['stem_w'], w['stem_b'],
                                 w['c1_w'], w['c1_b'],
                                 pre_scale=_ACT_GAMMA * _BETA,
                                 act_scale=_ACT_GAMMA)        # bf16 (N,HW,C)/(N,HW,Cm)

    # (2) c2 3x3 WS conv: rolled-tap matmuls, zero halo handled in-kernel.
    h2 = pallas_conv3x3(h, w['c2_taps'], w['c2_b'], H=H, W=Wsp,
                        act_scale=_ACT_GAMMA)                 # bf16 (N,HW,Cm)

    # (3) ECA gate + c3 + alpha residual + head -> logits, one fused kernel.
    logits_pad = pallas_eca_c3_head(h2, shortcut, w['eca_b'], w['c3_w'], w['c3_b'],
                                    w['fc_w'], w['fc_b'],
                                    attn_gain=_ATTN_GAIN,
                                    res_scale=w['res_scale'],
                                    act_scale=_ACT_GAMMA)     # (N, 1, 128) f32
    return logits_pad.reshape(x_nchw.shape[0], _LANE)[:, :w['num_classes']]


def nfnet_forward_reference(params, x_nchw):
    """Pure-jnp mirror of the fused pipeline (incl. bf16 storage rounding),
    used only for the in-script correctness check."""
    w = _prep_weights(params)
    f32, bf16 = jnp.float32, jnp.bfloat16
    rt = lambda a: a.astype(bf16).astype(f32)

    x = jnp.transpose(x_nchw, (0, 2, 3, 1)).astype(f32)
    patches, (N, H, Wsp) = _im2col(x, 3, 3, stride=2, pad=1, k_pad_to=w['k_pad'])
    s = jnp.einsum('nmk,kc->nmc', patches.astype(f32), w['stem_w'].astype(f32)) + w['stem_b']
    shortcut = rt(s)
    a = rt(_act(s) * (_ACT_GAMMA * _BETA))
    h = jnp.einsum('nmc,cd->nmd', a, w['c1_w'].astype(f32)) + w['c1_b']
    h = rt(_act(h) * _ACT_GAMMA)

    Cm = h.shape[-1]
    hp = jnp.pad(h.reshape(N, H, Wsp, Cm), ((0, 0), (1, 1), (1, 1), (0, 0)))
    out = jnp.zeros((N, H, Wsp, Cm), f32)
    for di in range(3):
        for dj in range(3):
            xs = hp[:, di:di + H, dj:dj + Wsp, :]
            out = out + jnp.einsum('nhwc,cd->nhwd', xs,
                                   w['c2_taps'][di * 3 + dj].astype(f32))
    h2 = rt(_act(out.reshape(N, H * Wsp, Cm) + w['c2_b']) * _ACT_GAMMA)

    pooled = jnp.mean(h2, axis=1, keepdims=True)                      # (N,1,Cm)
    ew = params['eca_w']
    band = (ew[0] * jnp.eye(Cm, k=1) + ew[1] * jnp.eye(Cm)
            + ew[2] * jnp.eye(Cm, k=-1)).astype(f32)
    gate = jax.nn.sigmoid(jnp.einsum('nrc,cd->nrd', pooled, band))
    a2 = rt(h2 * rt(gate * _ATTN_GAIN))
    acc = jnp.einsum('nmc,cd->nmd', a2, w['c3_w'].astype(f32)) + w['c3_b']
    res = shortcut + w['res_scale'] * acc
    feat = jnp.mean(_act(res) * _ACT_GAMMA, axis=1)                   # (N, C)
    logits = feat.astype(bf16).astype(f32) @ w['fc_w'].astype(f32) + w['fc_b']
    return logits[:, :w['num_classes']]


if __name__ == "__main__":
    key = jax.random.PRNGKey(0)
    pkey, xkey = jax.random.split(key)
    params = init_params(pkey, num_classes=18)
    # NCHW input, 3-channel image as expected by the NFNet backbone.
    x = jax.random.normal(xkey, (2, 3, 32, 32), jnp.float32)

    out = jax.block_until_ready(nfnet_forward(params, x))
    assert out.shape == (2, 18), out.shape
    assert bool(jnp.all(jnp.isfinite(out)))

    ref = jax.block_until_ready(nfnet_forward_reference(params, x))
    assert bool(jnp.allclose(out, ref, atol=5e-2, rtol=5e-2)), (
        float(jnp.max(jnp.abs(out - ref))))
    print("KERNEL_OK")
</pallas_src>

<mosaic_0001>
module attributes {stable_mosaic.version = 11 : i64} {
  func.func @_stem_c1_kernel(%arg0: i32, %arg1: i32, %arg2: memref<1x128x32xbf16, #tpu.memory_space<vmem>>, %arg3: memref<32x128xbf16, #tpu.memory_space<vmem>>, %arg4: memref<1x128xf32, #tpu.memory_space<vmem>>, %arg5: memref<128x128xbf16, #tpu.memory_space<vmem>>, %arg6: memref<1x128xf32, #tpu.memory_space<vmem>>, %arg7: memref<1x128x128xbf16, #tpu.memory_space<vmem>>, %arg8: memref<1x128x128xbf16, #tpu.memory_space<vmem>>) attributes {dimension_semantics = [#tpu.dimension_semantics<parallel>, #tpu.dimension_semantics<parallel>], iteration_bounds = array<i64: 2, 2>, scalar_prefetch = 0 : i64, scratch_operands = 0 : i64, tpu.core_type = #tpu.core_type<tc>, window_params = [{transform_indices = @transform_0, window_bounds = array<i64: 1, 128, 32>}, {pipeline_mode = #tpu.pipeline_mode<synchronous>, transform_indices = @transform_1, window_bounds = array<i64: 32, 128>}, {pipeline_mode = #tpu.pipeline_mode<synchronous>, transform_indices = @transform_2, window_bounds = array<i64: 1, 128>}, {pipeline_mode = #tpu.pipeline_mode<synchronous>, transform_indices = @transform_3, window_bounds = array<i64: 128, 128>}, {pipeline_mode = #tpu.pipeline_mode<synchronous>, transform_indices = @transform_4, window_bounds = array<i64: 1, 128>}, {transform_indices = @transform_5, window_bounds = array<i64: 1, 128, 128>}, {transform_indices = @transform_6, window_bounds = array<i64: 1, 128, 128>}]} {
    %c0 = arith.constant 0 : index
    %c0_0 = arith.constant 0 : index
    %c0_1 = arith.constant 0 : index
    %0 = vector.load %arg2[%c0, %c0_0, %c0_1] : memref<1x128x32xbf16, #tpu.memory_space<vmem>>, vector<1x128x32xbf16>
    %1 = vector.shape_cast %0 : vector<1x128x32xbf16> to vector<128x32xbf16>
    %c0_2 = arith.constant 0 : index
    %c0_3 = arith.constant 0 : index
    %2 = vector.load %arg3[%c0_2, %c0_3] : memref<32x128xbf16, #tpu.memory_space<vmem>>, vector<32x128xbf16>
    %cst = arith.constant dense<0.000000e+00> : vector<128x128xf32>
    %3 = tpu.matmul %1, %2, %cst {dimension_numbers = #tpu.dot_dimension_numbers<[1], [0], [0], [1], [0, 0, 1, 1], [], []>} : vector<128x32xbf16>, vector<32x128xbf16>, vector<128x128xf32> -> vector<128x128xf32>
    %c0_4 = arith.constant 0 : index
    %c0_5 = arith.constant 0 : index
    %4 = vector.load %arg4[%c0_4, %c0_5] : memref<1x128xf32, #tpu.memory_space<vmem>>, vector<1x128xf32>
    %5 = vector.broadcast %4 : vector<1x128xf32> to vector<128x128xf32>
    %6 = arith.addf %3, %5 : vector<128x128xf32>
    %7 = arith.truncf %6 : vector<128x128xf32> to vector<128x128xbf16>
    %c0_6 = arith.constant 0 : index
    %c0_7 = arith.constant 0 : index
    %c0_8 = arith.constant 0 : index
    %8 = vector.load %arg7[%c0_6, %c0_7, %c0_8] : memref<1x128x128xbf16, #tpu.memory_space<vmem>>, vector<1x128x128xbf16>
    %9 = vector.shape_cast %8 : vector<1x128x128xbf16> to vector<128x128xbf16>
    %10 = vector.shape_cast %7 : vector<128x128xbf16> to vector<1x128x128xbf16>
    tpu.vector_store %arg7[%c0_6, %c0_7, %c0_8], %10 {strides = array<i32>} : memref<1x128x128xbf16, #tpu.memory_space<vmem>>, vector<1x128x128xbf16>,
    %11 = arith.negf %6 : vector<128x128xf32>
    %12 = math.exp %11 : vector<128x128xf32>
    %cst_9 = arith.constant 1.000000e+00 : f32
    %13 = vector.broadcast %cst_9 : f32 to vector<128x128xf32>
    %14 = arith.addf %13, %12 : vector<128x128xf32>
    %15 = arith.divf %13, %14 : vector<128x128xf32>
    %16 = arith.mulf %6, %15 : vector<128x128xf32>
    %cst_10 = arith.constant 1.78812933 : f32
    %17 = vector.broadcast %cst_10 : f32 to vector<128x128xf32>
    %18 = arith.mulf %16, %17 : vector<128x128xf32>
    %19 = arith.truncf %18 : vector<128x128xf32> to vector<128x128xbf16>
    %c0_11 = arith.constant 0 : index
    %c0_12 = arith.constant 0 : index
    %20 = vector.load %arg5[%c0_11, %c0_12] : memref<128x128xbf16, #tpu.memory_space<vmem>>, vector<128x128xbf16>
    %cst_13 = arith.constant dense<0.000000e+00> : vector<128x128xf32>
    %21 = tpu.matmul %19, %20, %cst_13 {dimension_numbers = #tpu.dot_dimension_numbers<[1], [0], [0], [1], [0, 0, 1, 1], [], []>} : vector<128x128xbf16>, vector<128x128xbf16>, vector<128x128xf32> -> vector<128x128xf32>
    %c0_14 = arith.constant 0 : index
    %c0_15 = arith.constant 0 : index
    %22 = vector.load %arg6[%c0_14, %c0_15] : memref<1x128xf32, #tpu.memory_space<vmem>>, vector<1x128xf32>
    %23 = vector.broadcast %22 : vector<1x128xf32> to vector<128x128xf32>
    %24 = arith.addf %21, %23 : vector<128x128xf32>
    %25 = arith.negf %24 : vector<128x128xf32>
    %26 = math.exp %25 : vector<128x128xf32>
    %cst_16 = arith.constant 1.000000e+00 : f32
    %27 = vector.broadcast %cst_16 : f32 to vector<128x128xf32>
    %28 = arith.addf %27, %26 : vector<128x128xf32>
    %29 = arith.divf %27, %28 : vector<128x128xf32>
    %30 = arith.mulf %24, %29 : vector<128x128xf32>
    %cst_17 = arith.constant 1.78812933 : f32
    %31 = vector.broadcast %cst_17 : f32 to vector<128x128xf32>
    %32 = arith.mulf %30, %31 : vector<128x128xf32>
    %33 = arith.truncf %32 : vector<128x128xf32> to vector<128x128xbf16>
    %c0_18 = arith.constant 0 : index
    %c0_19 = arith.constant 0 : index
    %c0_20 = arith.constant 0 : index
    %34 = vector.load %arg8[%c0_18, %c0_19, %c0_20] : memref<1x128x128xbf16, #tpu.memory_space<vmem>>, vector<1x128x128xbf16>
    %35 = vector.shape_cast %34 : vector<1x128x128xbf16> to vector<128x128xbf16>
    %36 = vector.shape_cast %33 : vector<128x128xbf16> to vector<1x128x128xbf16>
    tpu.vector_store %arg8[%c0_18, %c0_19, %c0_20], %36 {strides = array<i32>} : memref<1x128x128xbf16, #tpu.memory_space<vmem>>, vector<1x128x128xbf16>,
    return
  }
  func.func @transform_0(%arg0: i32, %arg1: i32) -> (i32, i32, i32) {
    %c0_i32 = arith.constant 0 : i32
    %c0_i32_0 = arith.constant 0 : i32
    return %arg0, %arg1, %c0_i32 : i32, i32, i32
  }
  func.func @transform_1(%arg0: i32, %arg1: i32) -> (i32, i32) {
    %c0_i32 = arith.constant 0 : i32
    %c0_i32_0 = arith.constant 0 : i32
    %c0_i32_1 = arith.constant 0 : i32
    return %c0_i32, %c0_i32_0 : i32, i32
  }
  func.func @transform_2(%arg0: i32, %arg1: i32) -> (i32, i32) {
    %c0_i32 = arith.constant 0 : i32
    %c0_i32_0 = arith.constant 0 : i32
    %c0_i32_1 = arith.constant 0 : i32
    return %c0_i32, %c0_i32_0 : i32, i32
  }
  func.func @transform_3(%arg0: i32, %arg1: i32) -> (i32, i32) {
    %c0_i32 = arith.constant 0 : i32
    %c0_i32_0 = arith.constant 0 : i32
    %c0_i32_1 = arith.constant 0 : i32
    return %c0_i32, %c0_i32_0 : i32, i32
  }
  func.func @transform_4(%arg0: i32, %arg1: i32) -> (i32, i32) {
    %c0_i32 = arith.constant 0 : i32
    %c0_i32_0 = arith.constant 0 : i32
    %c0_i32_1 = arith.constant 0 : i32
    return %c0_i32, %c0_i32_0 : i32, i32
  }
  func.func @transform_5(%arg0: i32, %arg1: i32) -> (i32, i32, i32) {
    %c0_i32 = arith.constant 0 : i32
    %c0_i32_0 = arith.constant 0 : i32
    return %arg0, %arg1, %c0_i32 : i32, i32, i32
  }
  func.func @transform_6(%arg0: i32, %arg1: i32) -> (i32, i32, i32) {
    %c0_i32 = arith.constant 0 : i32
    %c0_i32_0 = arith.constant 0 : i32
    return %arg0, %arg1, %c0_i32 : i32, i32, i32
  }
}

</mosaic_0001>

<bundles_post_ra>
// kernel: tpu_custom_call.1
= control target key start
LH: loop header
LB: loop body
LE: loop exit
PB: predicated region body
PF: predicated region fallthrough
CT: control target
= control target key end

     0   :  { %12 = vsyncpa [#allocation3], 0  ;;  %s2400_s0 = inlined_call_operand.vmem [shape: bf16[2,256,32], index: 0, kind: input, shape index: {}]   ;;  %s2401_s1 = inlined_call_operand.vmem [shape: bf16[32,128], index: 1, kind: input, shape index: {}]   ;;  %s2402_s2 = inlined_call_operand.vmem [shape: f32[1,128], index: 2, kind: input, shape index: {}]   ;;  %s2403_s3 = inlined_call_operand.vmem [shape: bf16[128,128], index: 3, kind: input, shape index: {}]   ;;  %s2404_s4 = inlined_call_operand.vmem [shape: f32[1,128], index: 4, kind: input, shape index: {}]   ;;  %s2405_s5 = inlined_call_operand.hbm [shape: bf16[2,256,128], index: 5, kind: output, shape index: {0}]   ;;  %s2406_s6 = inlined_call_operand.hbm [shape: bf16[2,256,128], index: 6, kind: output, shape index: {1}]  }
   0x1   :  { %14 = vsyncpa [#allocation3 + $0x1], 0 }
   0x2   :  { %15 = vsyncpa [#allocation5], 0 }
   0x3   :  { %17 = vsyncpa [#allocation5 + $0x1], 0  ;;  %s1964_s21 = smov 0   ;;  %s1966_s22 = smov 0  }
   0x4   :  { %s1968_s23 = smov 0   ;;  %s1970_s24 = smov 0  }
   0x5   :  { %s1972_s25 = smov 0   ;;  %s1974_s26 = smov 0  }
   0x6   :  { %s1976_s27 = smov 0   ;;  %s1978_s28 = smov 0  }
   0x7 LB: > { %s1245_s29 = sadd.s32 4294967295, %s1923_s28   ;;  %s1246_s30 = sadd.s32 4294967294, %s1923_s28   ;;  %s1923_s28 = sphi %s1978_s28, %s23_s28   ;;  %s1919_s27 = sphi %s1976_s27, %s2422_s27   ;;  %s1915_s26 = sphi %s1974_s26, %s2421_s26   ;;  %s1911_s25 = sphi %s1972_s25, %s2420_s25   ;;  %s1907_s24 = sphi %s1970_s24, %s2419_s24   ;;  %s1903_s23 = sphi %s1968_s23, %s2418_s23   ;;  %s1899_s22 = sphi %s1966_s22, %s2417_s22   ;;  %s1895_s21 = sphi %s1964_s21, %s2416_s21  }
   0x8   : > { %s32_s7 = sadd.s32 1, %s1915_s26  ;;  %s35_s8 = sadd.s32 1, %s1919_s27 }
   0x9   : > { %p33_p0 = scmp.ge.s32.totalorder %s32_s7, 2  ;;  %p166_p1 = scmp.ne.s32.totalorder %s1903_s23, %s1899_s22 }
   0xa   : > { %p167_p2 = scmp.eq.s32.totalorder %s1245_s29, 3  ;;  %p172_p5 = scmp.ne.s32.totalorder %s1899_s22, %s1895_s21 }
   0xb   : > { %s2424_s7 = smov (%p33_p0, %s32_s7), 0  ;;  %s2426_s8 = smov (!%p33_p0, %s35_s8), %s1919_s27 }
   0xc   : > { %s152_s9 = ssub.s32 %s1915_s26, %s2424_s7  ;;  %p2015_p3 = por %p167_p2, %p166_p1 }
   0xd   : > { %p37_p4 = scmp.ge.s32.totalorder %s2426_s8, 2  ;;  %p173_p6 = scmp.eq.s32.totalorder %s1246_s30, 3 }
   0xe   : > { %p1249_p7 = scmp.ge.s32.totalorder %s1923_s28, 1  ;;  %p244_p9 = scmp.lt.s32.totalorder %s1923_s28, 5 }
   0xf   : > { %s2428_s8 = smov (%p37_p4, %s2426_s8), 0  ;;  %p2024_p8 = por %p173_p6, %p172_p5 }
  0x10   : > { %s151_s12 = ssub.s32 %s1919_s27, %s2428_s8  ;;  %s156_s13 = sadd.s32 1, %s1903_s23 }
  0x11   : > { %s153_s14 = sor.u32 %s152_s9, %s151_s12  ;;  %p245_p10 = pnand %p1249_p7, %p244_p9 }
  0x12   : > { %p154_p11 = scmp.eq.s32.totalorder %s153_s14, 0  ;;  %s2039_s18 = sshll.u32 (!%p245_p10), %s1907_s24, 4 }
  0x13   : > { %248 = sbr.rel (%p245_p10) target bundleno = 551 (0x227), region = 40  ;;  %p284_p12 = scmp.lt.s32.totalorder (!%p245_p10), %s1911_s25, 1 }
  0x14   : > { %s2033_s15 = scalar_select %p154_p11, %s1903_s23, %s156_s13  }
  0x15   : > { %p286_p13 = scmp.lt.s32.totalorder (!%p245_p10), %s2039_s18, 31 }
  0x18   : > { %v1655_v0 = vld [vmem:[%s2401_s1 + $0x8] sm:$0xff]   ;;  %v1656_v1 = vld [vmem:[%s2401_s1] sm:$0xff]   ;;  %s285_s29 = scalar_select %p284_p12, %s1911_s25, 1  ;;  %vm375_vm0 = vcmask 261120   ;;  %v1665_v10 = vld [vmem:[%s2403_s3 + $0x38] sm:$0xff]  }
  0x19   : > { %1509 = vmatprep.subr.bf16.mxu0 %v1655_v0  ;;  %s287_s30 = scalar_select %p286_p13, %s2039_s18, 31  ;;  %1561 = vmatprep.subr.bf16.mxu1 %v1665_v10  ;;  %v1666_v11 = vld [vmem:[%s2403_s3 + $0x30] sm:$0xff]   ;;  %v1667_v12 = vld [vmem:[%s2403_s3 + $0x28] sm:$0xff]   ;;  %v1668_v13 = vld [vmem:[%s2403_s3 + $0x20] sm:$0xff]  }
  0x1a   : > { %1510 = vmatpush3.bf16.msra.mxu0 %v1655_v0  ;;  %s1253_s9 = sshll.u32 %s285_s29, 5  ;;  %1569 = vmatpush3.bf16.msra.mxu1 %v1665_v10  ;;  %v1669_v14 = vld [vmem:[%s2403_s3 + $0x18] sm:$0xff]   ;;  %v1670_v15 = vld [vmem:[%s2403_s3 + $0x10] sm:$0xff]   ;;  %v1671_v16 = vld [vmem:[%s2403_s3 + $0x8] sm:$0xff]  }
  0x1b   : > { %1511 = vmatprep.subr.bf16.mxu0 %v1656_v1  ;;  %s289_s12 = sadd.s32 %s1253_s9, %s287_s30  ;;  %1562 = vmatprep.subr.bf16.mxu1 %v1666_v11  ;;  %v1672_v17 = vld [vmem:[%s2403_s3] sm:$0xff]  }
  0x1c   : > { %s1254_s13 = sshll.u32 %s289_s12, 2  ;;  %v2086_v18 = vld [vmem:[%s2402_s2] ss:$0 sm:$0xff] }
  0x1d   : > { %s291_s16 = scalar_lea.vmem %s2400_s0, %s1254_s13  ;;  %s2089_s13 = sand.u32 1, %s1899_s22  }
  0x1e   : > { %1512 = vmatpush3.bf16.msra.mxu0 %v1656_v1  ;;  %v1657_v2 = vld [vmem:[%s291_s16] sm:$0xff]   ;;  %v1658_v3 = vld [vmem:[%s291_s16 + $0x8] sm:$0xff]   ;;  %v1659_v4 = vld [vmem:[%s291_s16 + $0x10] sm:$0xff]   ;;  %1570 = vmatpush3.bf16.msra.mxu1 %v1666_v11  ;;  %s2407_s24 = sshll.u32 %s2089_s13, 6 }
  0x1f   : > { %1513 = vmatprep.mubr.msk.bf16.mxu0 %vm375_vm0, %v1657_v2  ;;  %v1660_v5 = vld [vmem:[%s291_s16 + $0x18] sm:$0xff]   ;;  %v1661_v6 = vld [vmem:[%s291_s16 + $0x20] sm:$0xff]   ;;  %v1662_v7 = vld [vmem:[%s291_s16 + $0x28] sm:$0xff]   ;;  %1529 = vmatprep.subr.bf16.mxu0 %v1665_v10  ;;  %s2111_s14 = scalar_lea.vmem [#allocation2], %s2407_s24 }
  0x20   : > { %v1663_v8 = vld [vmem:[%s291_s16 + $0x30] sm:$0xff]   ;;  %v1664_v9 = vld [vmem:[%s291_s16 + $0x38] sm:$0xff]   ;;  %1563 = vmatprep.subr.bf16.mxu1 %v1667_v12  ;;  %s1350_s16 = sshll.u32 %s1911_s25, 5  ;;  %s1110_s20 = sshll.u32 %s2111_s14, 4  ;;  %s2213_s20 = int_to_ptr.vmem [resolvable:$true] %s1110_s20 }
  0x21   : > { %1514 = vmatmul.mubr.msk.bf16.vlgmr.msra.gmra.mxu0 %vm375_vm0, %v1658_v3  ;;  %s2202_s17 = sadd.s32 %s1350_s16, %s2039_s18  ;;  %s1801_s24 = scalar_lea.vmem %s2213_s20, 1024 }
  0x22   : > { %1517 = vmatprep.mubr.msk.bf16.mxu0 %vm375_vm0, %v1659_v4  ;;  %1530 = vmatpush3.bf16.msra.mxu0 %v1665_v10  ;;  %s2408_s19 = sshll.u32 %s2202_s17, 6  ;;  %p1802_p0 = scmp.ne.s32.totalorder %s2213_s20, %s1801_s24 }
  0x23   : > { %1531 = vmatprep.subr.bf16.mxu0 %v1666_v11  ;;  %1571 = vmatpush3.bf16.msra.mxu1 %v1667_v12  ;;  %s2211_s9 = scalar_lea.hbm %s2405_s5, %s2408_s19  ;;  %s1925_s25 = smov [#allocation2]  }
  0x24   : > { %1564 = vmatprep.subr.bf16.mxu1 %v1668_v13  ;;  %p1803_p1 = pnand %p1802_p0, %p2015_p3  ;;  %s1805_s18 = sshll.u32 %s1925_s25, 4  ;;  %s1806_s18 = int_to_ptr.vmem [resolvable:$false] %s1805_s18 }
  0x25   : > { %p1808_p4 = scmp.lt.s32.totalorder %s2213_s20, %s1806_s18 }
  0x26   : > { %1532 = vmatpush3.bf16.msra.mxu0 %v1666_v11  ;;  %p1804_p2 = pneg %p1803_p1 }
  0x27   : > { %1533 = vmatprep.subr.bf16.mxu0 %v1667_v12  ;;  %1572 = vmatpush3.bf16.msra.mxu1 %v1668_v13 }
  0x28   : > { %1565 = vmatprep.subr.bf16.mxu1 %v1669_v14 }
  0x29   : > { %1518 = vmatmul.mubr.msk.bf16.gmra.mxu0 %vm375_vm0, %v1660_v5 }
  0x2a   : > { %1521 = vmatprep.mubr.msk.bf16.mxu0 %vm375_vm0, %v1661_v6  ;;  %1534 = vmatpush3.bf16.msra.mxu0 %v1667_v12 }
  0x2b   : > { %1535 = vmatprep.subr.bf16.mxu0 %v1668_v13  ;;  %1573 = vmatpush3.bf16.msra.mxu1 %v1669_v14 }
  0x2c   : > { %1566 = vmatprep.subr.bf16.mxu1 %v1670_v15 }
  0x2e   : > { %1536 = vmatpush3.bf16.msra.mxu0 %v1668_v13 }
  0x2f   : > { %1537 = vmatprep.subr.bf16.mxu0 %v1669_v14  ;;  %1574 = vmatpush3.bf16.msra.mxu1 %v1670_v15 }
  0x30   : > { %1567 = vmatprep.subr.bf16.mxu1 %v1671_v16 }
  0x31   : > { %1522 = vmatmul.mubr.msk.bf16.gmra.mxu0 %vm375_vm0, %v1662_v7 }
  0x32   : > { %1525 = vmatprep.mubr.msk.bf16.mxu0 %vm375_vm0, %v1663_v8  ;;  %1538 = vmatpush3.bf16.msra.mxu0 %v1669_v14 }
  0x33   : > { %1539 = vmatprep.subr.bf16.mxu0 %v1670_v15  ;;  %1575 = vmatpush3.bf16.msra.mxu1 %v1671_v16 }
  0x34   : > { %1568 = vmatprep.subr.bf16.mxu1 %v1672_v17 }
  0x36   : > { %1540 = vmatpush3.bf16.msra.mxu0 %v1670_v15 }
  0x37   : > { %1541 = vmatprep.subr.bf16.mxu0 %v1671_v16  ;;  %1576 = vmatpush3.bf16.msra.mxu1 %v1672_v17 }
  0x39   : > { %1526 = vmatmul.mubr.msk.bf16.gmra.mxu0 %vm375_vm0, %v1664_v9 }
  0x3a   : > { %1542 = vmatpush3.bf16.msra.mxu0 %v1671_v16 }
  0x3b   : > { %1543 = vmatprep.subr.bf16.mxu0 %v1672_v17 }
  0x3e   : > { %1544 = vmatpush3.bf16.msra.mxu0 %v1672_v17 }
  0xe1   : > { %v1515_v19 = vpop.f32.mrf.mxu0 }
  0xe2   : > { %v2092_v20 = vadd.f32 %v1515_v19, %v2086_v18 }
  0xe3   : > { %v434_v21 = vpop.f32.mrf.mxu0 }
  0xe4   : > { %v1292_v22 = vmul.f32 -1.442695, %v2092_v20  ;;  %v2096_v23 = vadd.f32 %v2086_v18, %v434_v21 }
  0xe5   : > { %v1516_v24 = vpop.f32.mrf.mxu0 }
  0xe6   : > { %1673 = vpow2.f32 %v1292_v22  ;;  %v1290_v25 = vmul.f32 -1.442695, %v2096_v23  ;;  %v2101_v26 = vadd.f32 %v1516_v24, %v2086_v18 }
  0xe7   : > { %v437_v27 = vpop.f32.mrf.mxu0 }
  0xe8   : > { %1675 = vpow2.f32 %v1290_v25  ;;  %v1397_v28 = vpack.c.bf16 %v2101_v26, %v2092_v20  ;;  %v1293_v29 = vmul.f32 -1.442695, %v2101_v26  ;;  %v2107_v30 = vadd.f32 %v2086_v18, %v437_v27 }
  0xe9   : > { %v1519_v31 = vpop.f32.mrf.mxu0 }
  0xea   : > { %1469 = vst [vmem:[%s2111_s14 + $0x8] sm:$0xff] %v1397_v28   ;;  %1677 = vpow2.f32 %v1293_v29  ;;  %v1392_v32 = vpack.c.bf16 %v2107_v30, %v2096_v23  ;;  %v1291_v33 = vmul.f32 -1.442695, %v2107_v30  ;;  %v2118_v34 = vadd.f32 %v1519_v31, %v2086_v18 }
  0xeb   : > { %v450_v35 = vpop.f32.mrf.mxu0 }
  0xec   : > { %1393 = vst [vmem:[%s2111_s14] sm:$0xff] %v1392_v32   ;;  %1679 = vpow2.f32 %v1291_v33  ;;  %v1296_v36 = vmul.f32 -1.442695, %v2118_v34  ;;  %v2123_v37 = vadd.f32 %v2086_v18, %v450_v35 }
  0xed   : > { %v1520_v38 = vpop.f32.mrf.mxu0 }
  0xee   : > { %1681 = vpow2.f32 %v1296_v36  ;;  %v1294_v39 = vmul.f32 -1.442695, %v2123_v37  ;;  %v2127_v40 = vadd.f32 %v1520_v38, %v2086_v18 }
  0xef   : > { %v453_v41 = vpop.f32.mrf.mxu0 }
  0xf0   : > { %1683 = vpow2.f32 %v1294_v39  ;;  %v1407_v42 = vpack.c.bf16 %v2127_v40, %v2118_v34  ;;  %v1297_v43 = vmul.f32 -1.442695, %v2127_v40  ;;  %v2133_v44 = vadd.f32 %v2086_v18, %v453_v41 }
  0xf1   : > { %v1523_v45 = vpop.f32.mrf.mxu0 }
  0xf2   : > { %1471 = vst [vmem:[%s2111_s14 + $0x18] sm:$0xff] %v1407_v42   ;;  %1685 = vpow2.f32 %v1297_v43  ;;  %v1402_v46 = vpack.c.bf16 %v2133_v44, %v2123_v37  ;;  %v1295_v47 = vmul.f32 -1.442695, %v2133_v44  ;;  %v2140_v48 = vadd.f32 %v1523_v45, %v2086_v18 }
  0xf3   : > { %v1674_v49 = vpop.eup %1673  ;;  %v466_v50 = vpop.f32.mrf.mxu0 }
  0xf4   : > { %v627_v51 = vadd.f32 1.0, %v1674_v49  ;;  %1470 = vst [vmem:[%s2111_s14 + $0x10] sm:$0xff] %v1402_v46   ;;  %1687 = vpow2.f32 %v1295_v47  ;;  %v1300_v52 = vmul.f32 -1.442695, %v2140_v48  ;;  %v2145_v53 = vadd.f32 %v2086_v18, %v466_v50 }
  0xf5   : > { %v1676_v54 = vpop.eup %1675  ;;  %v1524_v55 = vpop.f32.mrf.mxu0 }
  0xf6   : > { %1689 = vrcp.f32 %v627_v51  ;;  %v625_v56 = vadd.f32 1.0, %v1676_v54  ;;  %v1298_v57 = vmul.f32 -1.442695, %v2145_v53  ;;  %v2149_v58 = vadd.f32 %v1524_v55, %v2086_v18 }
  0xf7   : > { %v1678_v59 = vpop.eup %1677  ;;  %1691 = vpow2.f32 %v1300_v52  ;;  %v469_v60 = vpop.f32.mrf.mxu0 }
  0xf8   : > { %1693 = vrcp.f32 %v625_v56  ;;  %v628_v61 = vadd.f32 1.0, %v1678_v59  ;;  %v1417_v62 = vpack.c.bf16 %v2149_v58, %v2140_v48  ;;  %v1301_v63 = vmul.f32 -1.442695, %v2149_v58 }
  0xf9   : > { %v1680_v0 = vpop.eup %1679  ;;  %1695 = vpow2.f32 %v1298_v57  ;;  %v2155_v1 = vadd.f32 %v2086_v18, %v469_v60  ;;  %v1527_v2 = vpop.f32.mrf.mxu0 }
  0xfa   : > { %1697 = vrcp.f32 %v628_v61  ;;  %v626_v3 = vadd.f32 1.0, %v1680_v0  ;;  %1473 = vst [vmem:[%s2111_s14 + $0x28] sm:$0xff] %v1417_v62   ;;  %v2159_v4 = vadd.f32 %v1527_v2, %v2086_v18 }
  0xfb   : > { %v1682_v5 = vpop.eup %1681  ;;  %1699 = vpow2.f32 %v1301_v63  ;;  %v1412_v6 = vpack.c.bf16 %v2155_v1, %v2145_v53  ;;  %v1299_v7 = vmul.f32 -1.442695, %v2155_v1  ;;  %v482_v8 = vpop.f32.mrf.mxu0 }
  0xfc   : > { %1701 = vrcp.f32 %v626_v3  ;;  %v631_v9 = vadd.f32 1.0, %v1682_v5  ;;  %v1304_v10 = vmul.f32 -1.442695, %v2159_v4  ;;  %v2166_v11 = vadd.f32 %v2086_v18, %v482_v8 }
  0xfd   : > { %v1684_v12 = vpop.eup %1683  ;;  %1472 = vst [vmem:[%s2111_s14 + $0x20] sm:$0xff] %v1412_v6   ;;  %1703 = vpow2.f32 %v1299_v7  ;;  %v1528_v13 = vpop.f32.mrf.mxu0 }
  0xfe   : > { %1705 = vrcp.f32 %v631_v9  ;;  %v629_v14 = vadd.f32 1.0, %v1684_v12  ;;  %v1302_v15 = vmul.f32 -1.442695, %v2166_v11  ;;  %v2171_v16 = vadd.f32 %v1528_v13, %v2086_v18 }
  0xff   : > { %v1686_v17 = vpop.eup %1685  ;;  %1707 = vpow2.f32 %v1304_v10  ;;  %v485_v19 = vpop.f32.mrf.mxu0 }
 0x100   : > { %1709 = vrcp.f32 %v629_v14  ;;  %v632_v21 = vadd.f32 1.0, %v1686_v17  ;;  %v1427_v22 = vpack.c.bf16 %v2171_v16, %v2159_v4  ;;  %v1305_v24 = vmul.f32 -1.442695, %v2171_v16 }
 0x101   : > { %v1688_v25 = vpop.eup %1687  ;;  %1711 = vpow2.f32 %v1302_v15  ;;  %v2177_v27 = vadd.f32 %v2086_v18, %v485_v19 }
 0x102   : > { %1713 = vrcp.f32 %v632_v21  ;;  %v630_v28 = vadd.f32 1.0, %v1688_v25  ;;  %1475 = vst [vmem:[%s2111_s14 + $0x38] sm:$0xff] %v1427_v22  }
 0x103   : > { %v1690_v29 = vpop.eup %1689  ;;  %1715 = vpow2.f32 %v1305_v24  ;;  %v1422_v31 = vpack.c.bf16 %v2177_v27, %v2166_v11  ;;  %v1303_v32 = vmul.f32 -1.442695, %v2177_v27 }
 0x104   : > { %v1692_v33 = vpop.eup %1691  ;;  %1717 = vrcp.f32 %v630_v28  ;;  %v675_v46 = vmul.f32 %v1690_v29, %v2092_v20 }
 0x105   : > { %v1694_v35 = vpop.eup %1693  ;;  %1474 = vst [vmem:[%s2111_s14 + $0x30] sm:$0xff] %v1422_v31   ;;  %1719 = vpow2.f32 %v1303_v32  ;;  %v635_v38 = vadd.f32 1.0, %v1692_v33  ;;  %s1807_s14 = scalar_lea.vmem %s1806_s18, 2048 }
 0x106   : > { %v1696_v36 = vpop.eup %1695  ;;  %v673_v42 = vmul.f32 %v1694_v35, %v2096_v23  ;;  %v691_v23 = vmul.f32 1.7881293, %v675_v46  ;;  %p1809_p5 = scmp.lt.s32.totalorder %s1807_s14, %s1801_s24 }
 0x107   : > { %v1698_v39 = vpop.eup %1697  ;;  %v633_v18 = vadd.f32 1.0, %v1696_v36 }
 0x108   : > { %v1700_v41 = vpop.eup %1699  ;;  %v676_v43 = vmul.f32 %v1698_v39, %v2101_v26  ;;  %v689_v56 = vmul.f32 1.7881293, %v673_v42  ;;  %p1810_p6 = por %p1809_p5, %p1808_p4 }
 0x109   : > { %v1702_v45 = vpop.eup %1701  ;;  %1721 = vrcp.f32 %v633_v18  ;;  %v636_v47 = vadd.f32 1.0, %v1700_v41 }
 0x10a   : > { %v1704_v49 = vpop.eup %1703  ;;  %v674_v50 = vmul.f32 %v1702_v45, %v2107_v30  ;;  %1723 = vrcp.f32 %v635_v38  ;;  %v692_v52 = vmul.f32 1.7881293, %v676_v43  ;;  %p1811_p7 = pnand %p1810_p6, %p1804_p2 }
 0x10b   : > { %v1706_v51 = vpop.eup %1705  ;;  %1725 = vrcp.f32 %v636_v47  ;;  %v634_v54 = vadd.f32 1.0, %v1704_v49 }
 0x10c   : > { %v1708_v55 = vpop.eup %1707  ;;  %v690_v57 = vmul.f32 1.7881293, %v674_v50  ;;  %v706_v62 = vpack.c.bf16 %v692_v52, %v691_v23  ;;  %v679_v5 = vmul.f32 %v1706_v51, %v2118_v34 }
 0x10d   : > { %v1710_v59 = vpop.eup %1709  ;;  %1727 = vrcp.f32 %v634_v54  ;;  %v639_v60 = vadd.f32 1.0, %v1708_v55 }
 0x10e   : > { %v1712_v26 = vpop.eup %1711  ;;  %v705_v61 = vpack.c.bf16 %v690_v57, %v689_v56  ;;  %v677_v2 = vmul.f32 %v1710_v59, %v2123_v37  ;;  %v695_v14 = vmul.f32 1.7881293, %v679_v5 }
 0x10f   : > { %v1714_v20 = vpop.eup %1713  ;;  %v637_v63 = vadd.f32 1.0, %v1712_v26 }
 0x110   : > { %v1716_v0 = vpop.eup %1715  ;;  %v680_v30 = vmul.f32 %v1714_v20, %v2127_v40  ;;  %1545 = vmatprep.mubr.bf16.mxu0 %v705_v61  ;;  %v693_v12 = vmul.f32 1.7881293, %v677_v2 }
 0x111   : > { %v1718_v3 = vpop.eup %1717  ;;  %1729 = vrcp.f32 %v637_v63  ;;  %v640_v6 = vadd.f32 1.0, %v1716_v0  ;;  %1546 = vmatmul.mubr.bf16.vlgmr.msra.gmra.mxu0 %v706_v62 }
 0x112   : > { %v1720_v7 = vpop.eup %1719  ;;  %1731 = vrcp.f32 %v639_v60  ;;  %v678_v8 = vmul.f32 %v1718_v3, %v2133_v44  ;;  %v696_v9 = vmul.f32 1.7881293, %v680_v30 }
 0x113   : > { %1733 = vrcp.f32 %v640_v6  ;;  %v638_v10 = vadd.f32 1.0, %v1720_v7 }
 0x114   : > { %v694_v13 = vmul.f32 1.7881293, %v678_v8  ;;  %v708_v17 = vpack.c.bf16 %v696_v9, %v695_v14 }
 0x115   : > { %1735 = vrcp.f32 %v638_v10 }
 0x116   : > { %v1722_v40 = vpop.eup %1721  ;;  %v707_v15 = vpack.c.bf16 %v694_v13, %v693_v12 }
 0x117   : > { %v1724_v37 = vpop.eup %1723  ;;  %v681_v34 = vmul.f32 %v1722_v40, %v2145_v53 }
 0x118   : > { %v1726_v19 = vpop.eup %1725  ;;  %1549 = vmatprep.mubr.bf16.mxu1 %v707_v15  ;;  %v683_v44 = vmul.f32 %v1724_v37, %v2140_v48 }
 0x119   : > { %v684_v21 = vmul.f32 %v1726_v19, %v2149_v58  ;;  %1550 = vmatmul.mubr.bf16.vlgmr.msra.gmra.mxu1 %v708_v17  ;;  %v697_v28 = vmul.f32 1.7881293, %v681_v34 }
 0x11a   : > { %v1728_v22 = vpop.eup %1727  ;;  %v699_v32 = vmul.f32 1.7881293, %v683_v44 }
 0x11b   : > { %v682_v24 = vmul.f32 %v1728_v22, %v2155_v1  ;;  %v700_v25 = vmul.f32 1.7881293, %v684_v21 }
 0x11d   : > { %v698_v29 = vmul.f32 1.7881293, %v682_v24  ;;  %v710_v38 = vpack.c.bf16 %v700_v25, %v699_v32 }
 0x11e   : > { %v1730_v31 = vpop.eup %1729 }
 0x11f   : > { %v1732_v33 = vpop.eup %1731  ;;  %v709_v35 = vpack.c.bf16 %v698_v29, %v697_v28  ;;  %v685_v53 = vmul.f32 %v1730_v31, %v2166_v11 }
 0x120   : > { %v1734_v36 = vpop.eup %1733  ;;  %v687_v1 = vmul.f32 %v1732_v33, %v2159_v4 }
 0x121   : > { %v688_v58 = vmul.f32 %v1734_v36, %v2171_v16  ;;  %1553 = vmatprep.mubr.bf16.mxu1 %v709_v35  ;;  %v701_v41 = vmul.f32 1.7881293, %v685_v53 }
 0x122   : > { %v1736_v48 = vpop.eup %1735  ;;  %1554 = vmatmul.mubr.bf16.gmra.mxu1 %v710_v38  ;;  %v703_v43 = vmul.f32 1.7881293, %v687_v1 }
 0x123   : > { %v686_v39 = vmul.f32 %v1736_v48, %v2177_v27  ;;  %v704_v18 = vmul.f32 1.7881293, %v688_v58 }
 0x125   : > { %v702_v42 = vmul.f32 1.7881293, %v686_v39  ;;  %v712_v46 = vpack.c.bf16 %v704_v18, %v703_v43 }
 0x127   : > { %v711_v45 = vpack.c.bf16 %v702_v42, %v701_v41 }
 0x129   : > { %1557 = vmatprep.mubr.bf16.mxu1 %v711_v45 }
 0x12a   : > { %1558 = vmatmul.mubr.bf16.gmra.mxu1 %v712_v46 }
 0x12b   : > { %1814 = shalt.err (!%p1811_p7)
}
 0x12c   : > { %s1815_s16 = scalar_lea.hbm %s2211_s9, 1024  ;;  %s1819_s25 = scalar_lea.hbm %s2405_s5, 4096 }
 0x12d   : > { %p1816_p9 = scmp.ne.s32.totalorder %s2211_s9, %s1815_s16  ;;  %p1820_p12 = scmp.lt.s32.totalorder %s2211_s9, %s2405_s5 }
 0x12e   : > { %p1821_p13 = scmp.lt.s32.totalorder %s1819_s25, %s1815_s16 }
 0x12f   : > { %p1817_p10 = pnand %p1816_p9, %p2015_p3 }
 0x130   : > { %p1822_p0 = por %p1821_p13, %p1820_p12 }
 0x131   : > { %p1818_p11 = pneg %p1817_p10 }
 0x133   : > { %p1823_p1 = pnand %p1822_p0, %p1818_p11 }
 0x135   : > { %1826 = shalt.err (!%p1823_p1)
}
 0x136   : > { %s2409_s24 = smov 64   ;;  %s1927_s18 = smov 4   ;;  %v2244_v4 = vld [vmem:[%s2404_s4] ss:$0 sm:$0xff] }
 0x137   : > { %s2412_s14 = scalar_lea.sflag [#allocation3], %s2089_s13  ;;  %s2413_s19 = sshll.u32 %s2089_s13, 6 }
 0x138   : > { %1577 = dma.vmem_to_hbm [thread:$0]  (%p2015_p3), %s2213_s20, 1024, %s2211_s9, %s2412_s14, %s2409_s24, %s2409_s24, %s1927_s18  }
 0x139   : > { %s2316_s20 = scalar_lea.vmem [#allocation4], %s2413_s19  ;;  %s2414_s12 = sshll.u32 %s2202_s17, 6 }
 0x13a   : > { %s1128_s9 = sshll.u32 %s2316_s20, 4  ;;  %s2343_s14 = scalar_lea.hbm %s2406_s6, %s2414_s12  ;;  %s2345_s9 = int_to_ptr.vmem [resolvable:$true] %s1128_s9 }
 0x13b   : > { %s1095_s29 = scalar_lea.sflag [#allocation5], %s2089_s13  ;;  %s1827_s30 = scalar_lea.vmem %s2345_s9, 1024 }
 0x13c   : > { %p1828_p2 = scmp.ne.s32.totalorder %s2345_s9, %s1827_s30  ;;  %s1928_s19 = smov [#allocation4]  }
 0x13d   : > { %s1831_s24 = sshll.u32 %s1928_s19, 4  ;;  %s1832_s24 = int_to_ptr.vmem [resolvable:$false] %s1831_s24 }
 0x13e   : > { %p1829_p4 = pnand %p1828_p2, %p2015_p3  ;;  %s1833_s17 = scalar_lea.vmem %s1832_s24, 2048 }
 0x13f   : > { %p1834_p6 = scmp.lt.s32.totalorder %s2345_s9, %s1832_s24  ;;  %p1835_p7 = scmp.lt.s32.totalorder %s1833_s17, %s1827_s30 }
 0x140   : > { %p1830_p5 = pneg %p1829_p4 }
 0x141   : > { %p1836_p9 = por %p1835_p7, %p1834_p6 }
 0x143   : > { %p1837_p10 = pnand %p1836_p9, %p1830_p5 }
 0x1d1   : > { %v1547_v11 = vpop.f32.mrf.mxu0 }
 0x1d2   : > { %v2247_v16 = vadd.f32 %v1547_v11, %v2244_v4 }
 0x1d3   : > { %v818_v27 = vpop.f32.mrf.mxu0 }
 0x1d4   : > { %v1317_v47 = vmul.f32 -1.442695, %v2247_v16  ;;  %v2251_v49 = vadd.f32 %v2244_v4, %v818_v27 }
 0x1d5   : > { %v1548_v50 = vpop.f32.mrf.mxu0 }
 0x1d6   : > { %1737 = vpow2.f32 %v1317_v47  ;;  %v1315_v51 = vmul.f32 -1.442695, %v2251_v49  ;;  %v2255_v52 = vadd.f32 %v1548_v50, %v2244_v4 }
 0x1d7   : > { %v821_v54 = vpop.f32.mrf.mxu0 }
 0x1d8   : > { %1739 = vpow2.f32 %v1315_v51  ;;  %v1318_v55 = vmul.f32 -1.442695, %v2255_v52  ;;  %v2259_v56 = vadd.f32 %v2244_v4, %v821_v54 }
 0x1d9   : > { %v1551_v57 = vpop.f32.mrf.mxu1 }
 0x1da   : > { %1741 = vpow2.f32 %v1318_v55  ;;  %v1316_v59 = vmul.f32 -1.442695, %v2259_v56  ;;  %v2263_v23 = vadd.f32 %v1551_v57, %v2244_v4 }
 0x1db   : > { %v834_v26 = vpop.f32.mrf.mxu1 }
 0x1dc   : > { %1743 = vpow2.f32 %v1316_v59  ;;  %v1321_v60 = vmul.f32 -1.442695, %v2263_v23  ;;  %v2267_v61 = vadd.f32 %v2244_v4, %v834_v26 }
 0x1dd   : > { %v1552_v20 = vpop.f32.mrf.mxu1 }
 0x1de   : > { %1745 = vpow2.f32 %v1321_v60  ;;  %v1319_v62 = vmul.f32 -1.442695, %v2267_v61  ;;  %v2271_v63 = vadd.f32 %v1552_v20, %v2244_v4 }
 0x1df   : > { %v837_v0 = vpop.f32.mrf.mxu1 }
 0x1e0   : > { %1747 = vpow2.f32 %v1319_v62  ;;  %v1322_v30 = vmul.f32 -1.442695, %v2271_v63  ;;  %v2275_v2 = vadd.f32 %v2244_v4, %v837_v0 }
 0x1e2   : > { %1749 = vpow2.f32 %v1322_v30  ;;  %v1320_v3 = vmul.f32 -1.442695, %v2275_v2  ;;  %v1555_v5 = vpop.f32.mrf.mxu1 }
 0x1e3   : > { %v1738_v6 = vpop.eup %1737  ;;  %v2279_v7 = vadd.f32 %v1555_v5, %v2244_v4 }
 0x1e4   : > { %v931_v8 = vadd.f32 1.0, %v1738_v6  ;;  %1751 = vpow2.f32 %v1320_v3  ;;  %v850_v9 = vpop.f32.mrf.mxu1 }
 0x1e5   : > { %v1740_v10 = vpop.eup %1739  ;;  %v1325_v12 = vmul.f32 -1.442695, %v2279_v7  ;;  %v2283_v13 = vadd.f32 %v2244_v4, %v850_v9 }
 0x1e6   : > { %1753 = vrcp.f32 %v931_v8  ;;  %v929_v14 = vadd.f32 1.0, %v1740_v10  ;;  %v1556_v40 = vpop.f32.mrf.mxu1 }
 0x1e7   : > { %v1742_v15 = vpop.eup %1741  ;;  %1755 = vpow2.f32 %v1325_v12  ;;  %v1323_v37 = vmul.f32 -1.442695, %v2283_v13  ;;  %v2287_v17 = vadd.f32 %v1556_v40, %v2244_v4 }
 0x1e8   : > { %1757 = vrcp.f32 %v929_v14  ;;  %v932_v19 = vadd.f32 1.0, %v1742_v15  ;;  %v853_v34 = vpop.f32.mrf.mxu1 }
 0x1e9   : > { %v1744_v21 = vpop.eup %1743  ;;  %1759 = vpow2.f32 %v1323_v37  ;;  %v1326_v22 = vmul.f32 -1.442695, %v2287_v17  ;;  %v2291_v44 = vadd.f32 %v2244_v4, %v853_v34 }
 0x1ea   : > { %1761 = vrcp.f32 %v932_v19  ;;  %v930_v24 = vadd.f32 1.0, %v1744_v21  ;;  %v1559_v25 = vpop.f32.mrf.mxu1 }
 0x1eb   : > { %v1746_v28 = vpop.eup %1745  ;;  %1763 = vpow2.f32 %v1326_v22  ;;  %v1324_v29 = vmul.f32 -1.442695, %v2291_v44  ;;  %v2295_v31 = vadd.f32 %v1559_v25, %v2244_v4 }
 0x1ec   : > { %1765 = vrcp.f32 %v930_v24  ;;  %v935_v32 = vadd.f32 1.0, %v1746_v28  ;;  %v866_v33 = vpop.f32.mrf.mxu1 }
 0x1ed   : > { %v1748_v35 = vpop.eup %1747  ;;  %1767 = vpow2.f32 %v1324_v29  ;;  %v1329_v36 = vmul.f32 -1.442695, %v2295_v31  ;;  %v2299_v38 = vadd.f32 %v2244_v4, %v866_v33 }
 0x1ee   : > { %1769 = vrcp.f32 %v935_v32  ;;  %v933_v53 = vadd.f32 1.0, %v1748_v35  ;;  %v1560_v58 = vpop.f32.mrf.mxu1 }
 0x1ef   : > { %v1750_v48 = vpop.eup %1749  ;;  %1771 = vpow2.f32 %v1329_v36  ;;  %v1327_v1 = vmul.f32 -1.442695, %v2299_v38  ;;  %v2303_v39 = vadd.f32 %v1560_v58, %v2244_v4 }
 0x1f0   : > { %1773 = vrcp.f32 %v933_v53  ;;  %v936_v18 = vadd.f32 1.0, %v1750_v48  ;;  %v869_v41 = vpop.f32.mrf.mxu1 }
 0x1f1   : > { %v1752_v42 = vpop.eup %1751  ;;  %1775 = vpow2.f32 %v1327_v1  ;;  %v1330_v43 = vmul.f32 -1.442695, %v2303_v39  ;;  %v2307_v45 = vadd.f32 %v2244_v4, %v869_v41 }
 0x1f2   : > { %1777 = vrcp.f32 %v936_v18  ;;  %v934_v46 = vadd.f32 1.0, %v1752_v42 }
 0x1f3   : > { %v1754_v11 = vpop.eup %1753  ;;  %1779 = vpow2.f32 %v1330_v43  ;;  %v1328_v27 = vmul.f32 -1.442695, %v2307_v45 }
 0x1f4   : > { %v1756_v47 = vpop.eup %1755  ;;  %1781 = vrcp.f32 %v934_v46  ;;  %v979_v55 = vmul.f32 %v1754_v11, %v2247_v16 }
 0x1f5   : > { %v1758_v50 = vpop.eup %1757  ;;  %v939_v51 = vadd.f32 1.0, %v1756_v47  ;;  %1783 = vpow2.f32 %v1328_v27 }
 0x1f6   : > { %v1760_v54 = vpop.eup %1759  ;;  %v977_v4 = vmul.f32 %v1758_v50, %v2251_v49  ;;  %v995_v30 = vmul.f32 1.7881293, %v979_v55 }
 0x1f7   : > { %v1762_v57 = vpop.eup %1761  ;;  %1785 = vrcp.f32 %v939_v51  ;;  %v937_v59 = vadd.f32 1.0, %v1760_v54 }
 0x1f8   : > { %v1764_v26 = vpop.eup %1763  ;;  %v980_v60 = vmul.f32 %v1762_v57, %v2255_v52  ;;  %v993_v9 = vmul.f32 1.7881293, %v977_v4 }
 0x1f9   : > { %v1766_v20 = vpop.eup %1765  ;;  %1787 = vrcp.f32 %v937_v59  ;;  %v940_v62 = vadd.f32 1.0, %v1764_v26 }
 0x1fa   : > { %v1768_v0 = vpop.eup %1767  ;;  %v996_v3 = vmul.f32 1.7881293, %v980_v60  ;;  %v978_v5 = vmul.f32 %v1766_v20, %v2259_v56 }
 0x1fb   : > { %v1770_v6 = vpop.eup %1769  ;;  %1789 = vrcp.f32 %v940_v62  ;;  %v938_v16 = vadd.f32 1.0, %v1768_v0 }
 0x1fc   : > { %v1772_v8 = vpop.eup %1771  ;;  %v1437_v10 = vpack.c.bf16 %v996_v3, %v995_v30  ;;  %v994_v12 = vmul.f32 1.7881293, %v978_v5  ;;  %v983_v56 = vmul.f32 %v1770_v6, %v2263_v23 }
 0x1fd   : > { %v1774_v14 = vpop.eup %1773  ;;  %1791 = vrcp.f32 %v938_v16  ;;  %v943_v49 = vadd.f32 1.0, %v1772_v8 }
 0x1fe   : > { %v1776_v52 = vpop.eup %1775  ;;  %1476 = vst [vmem:[%s2316_s20 + $0x8] sm:$0xff] %v1437_v10   ;;  %v1432_v40 = vpack.c.bf16 %v994_v12, %v993_v9  ;;  %v981_v34 = vmul.f32 %v1774_v14, %v2267_v61  ;;  %v999_v28 = vmul.f32 1.7881293, %v983_v56 }
 0x1ff   : > { %v1778_v15 = vpop.eup %1777  ;;  %1793 = vrcp.f32 %v943_v49  ;;  %v941_v37 = vadd.f32 1.0, %v1776_v52 }
 0x200   : > { %v1780_v19 = vpop.eup %1779  ;;  %1433 = vst [vmem:[%s2316_s20] sm:$0xff] %v1432_v40   ;;  %v984_v21 = vmul.f32 %v1778_v15, %v2271_v63  ;;  %v997_v35 = vmul.f32 1.7881293, %v981_v34 }
 0x201   : > { %v1782_v22 = vpop.eup %1781  ;;  %1795 = vrcp.f32 %v941_v37  ;;  %v944_v24 = vadd.f32 1.0, %v1780_v19 }
 0x202   : > { %v1784_v25 = vpop.eup %1783  ;;  %v1000_v29 = vmul.f32 1.7881293, %v984_v21  ;;  %v982_v32 = vmul.f32 %v1782_v22, %v2275_v2 }
 0x203   : > { %1797 = vrcp.f32 %v944_v24  ;;  %v942_v23 = vadd.f32 1.0, %v1784_v25 }
 0x204   : > { %v1786_v33 = vpop.eup %1785  ;;  %v1447_v36 = vpack.c.bf16 %v1000_v29, %v999_v28  ;;  %v998_v53 = vmul.f32 1.7881293, %v982_v32 }
 0x205   : > { %1799 = vrcp.f32 %v942_v23  ;;  %v987_v58 = vmul.f32 %v1786_v33, %v2279_v7 }
 0x206   : > { %v1788_v61 = vpop.eup %1787  ;;  %1478 = vst [vmem:[%s2316_s20 + $0x18] sm:$0xff] %v1447_v36   ;;  %v1442_v63 = vpack.c.bf16 %v998_v53, %v997_v35 }
 0x207   : > { %v985_v1 = vmul.f32 %v1788_v61, %v2283_v13  ;;  %v1003_v41 = vmul.f32 1.7881293, %v987_v58 }
 0x208   : > { %v1790_v48 = vpop.eup %1789  ;;  %1477 = vst [vmem:[%s2316_s20 + $0x10] sm:$0xff] %v1442_v63  }
 0x209   : > { %v988_v2 = vmul.f32 %v1790_v48, %v2287_v17  ;;  %v1001_v11 = vmul.f32 1.7881293, %v985_v1 }
 0x20a   : > { %v1792_v18 = vpop.eup %1791 }
 0x20b   : > { %v1004_v42 = vmul.f32 1.7881293, %v988_v2  ;;  %v986_v43 = vmul.f32 %v1792_v18, %v2291_v44 }
 0x20c   : > { %v1794_v46 = vpop.eup %1793 }
 0x20d   : > { %v1457_v27 = vpack.c.bf16 %v1004_v42, %v1003_v41  ;;  %v1002_v47 = vmul.f32 1.7881293, %v986_v43  ;;  %v991_v51 = vmul.f32 %v1794_v46, %v2295_v31 }
 0x20e   : > { %v1796_v50 = vpop.eup %1795 }
 0x20f   : > { %1480 = vst [vmem:[%s2316_s20 + $0x28] sm:$0xff] %v1457_v27   ;;  %v1452_v7 = vpack.c.bf16 %v1002_v47, %v1001_v11  ;;  %v989_v17 = vmul.f32 %v1796_v50, %v2299_v38  ;;  %v1007_v55 = vmul.f32 1.7881293, %v991_v51 }
 0x210   : > { %v1798_v13 = vpop.eup %1797 }
 0x211   : > { %1479 = vst [vmem:[%s2316_s20 + $0x20] sm:$0xff] %v1452_v7   ;;  %v992_v44 = vmul.f32 %v1798_v13, %v2303_v39  ;;  %v1005_v26 = vmul.f32 1.7881293, %v989_v17 }
 0x212   : > { %v1800_v54 = vpop.eup %1799 }
 0x213   : > { %v1008_v57 = vmul.f32 1.7881293, %v992_v44  ;;  %v990_v59 = vmul.f32 %v1800_v54, %v2307_v45 }
 0x215   : > { %v1467_v4 = vpack.c.bf16 %v1008_v57, %v1007_v55  ;;  %v1006_v60 = vmul.f32 1.7881293, %v990_v59 }
 0x217   : > { %1482 = vst [vmem:[%s2316_s20 + $0x38] sm:$0xff] %v1467_v4   ;;  %v1462_v31 = vpack.c.bf16 %v1006_v60, %v1005_v26 }
 0x219   : > { %1481 = vst [vmem:[%s2316_s20 + $0x30] sm:$0xff] %v1462_v31  }
 0x21a   : > { %1840 = shalt.err (!%p1837_p10)
}
 0x21b   : > { %s1841_s20 = scalar_lea.hbm %s2343_s14, 1024  ;;  %s1845_s16 = scalar_lea.hbm %s2406_s6, 4096 }
 0x21c   : > { %p1842_p11 = scmp.ne.s32.totalorder %s2343_s14, %s1841_s20  ;;  %p1846_p0 = scmp.lt.s32.totalorder %s2343_s14, %s2406_s6 }
 0x21d   : > { %p1847_p1 = scmp.lt.s32.totalorder %s1845_s16, %s1841_s20 }
 0x21e   : > { %p1843_p12 = pnand %p1842_p11, %p2015_p3 }
 0x21f   : > { %p1848_p2 = por %p1847_p1, %p1846_p0 }
 0x220   : > { %p1844_p13 = pneg %p1843_p12 }
 0x222   : > { %p1849_p4 = pnand %p1848_p2, %p1844_p13 }
 0x224   : > { %1852 = shalt.err (!%p1849_p4)
}
 0x225   : > { %s2415_s24 = smov 64  }
 0x226   : > { %1578 = dma.vmem_to_hbm [thread:$0]  (%p2015_p3), %s2345_s9, 1024, %s2343_s14, %s1095_s29, %s2415_s24, %s2415_s24, %s1927_s18  }
 0x227 PF: > { %p1588_p5 = scmp.ge.s32.totalorder %s1923_s28, 2  ;;  %s1143_s30 = sand.u32 1, %s1895_s21  }
 0x228   : > { %s1144_s17 = scalar_lea.sflag [#allocation3], %s1143_s30 }
 0x229   : > { %p1582_p6 = pnand %p1588_p5, %p2024_p8 }
 0x22b   : > { %p1583_p7 = pneg %p1582_p6 }
 0x22d   : > { %1886 = dma.done.wait (%p1583_p7), %s1144_s17, 1024  }
 0x22e   : > { %1888 = vsyncadd (%p1583_p7), %s1144_s17, 4294966272  ;;  %s1153_s20 = scalar_lea.sflag [#allocation5], %s1143_s30 }
 0x22f   : > { %1890 = dma.done.wait (%p1583_p7), %s1153_s20, 1024  }
 0x230   : > { %1892 = vsyncadd (%p1583_p7), %s1153_s20, 4294966272  ;;  %s23_s28 = sadd.s32 1, %s1923_s28   ;;  %s2416_s21 = smov %s1899_s22 }
 0x231   : > { %p20_p9 = scmp.ge.s32.totalorder %s23_s28, 6   ;;  %s2417_s22 = smov %s1903_s23 }
 0x232   : > { %s2418_s23 = smov %s2033_s15  ;;  %s2419_s24 = smov %s1915_s26 }
 0x233   : > { %s2420_s25 = smov %s1919_s27  ;;  %s2421_s26 = smov %s2424_s7 }
 0x234   : > { %s2422_s27 = smov %s2428_s8  ;;  %22 = sbr.rel (!%p20_p9) target bundleno = 7 (0x7), region = 92 }
 0x239   :  { %1158 = vsyncpa [#allocation3], 1 }
 0x23a   :  { %1160 = vsyncpa [#allocation3 + $0x1], 1 }
 0x23b   :  { %1161 = vsyncpa [#allocation5], 1 }
 0x23c   :  { %1163 = vsyncpa [#allocation5 + $0x1], 1 }

</bundles_post_ra>
